<compile_context>
chip_gen: v7x
topology: tpu7x:2x2x1
jax: 0.10.0
libtpu: 0.0.40
codegen_flags: <defaults>
</compile_context>

<pallas_src>
import math
from functools import partial

import jax
import jax.numpy as jnp
from jax.experimental import pallas as pl
from jax.experimental.pallas import tpu as pltpu


def _mha_kernel(q_ref, k_ref, v_ref, madd_ref,
                wq_ref, bq_ref, wk_ref, bk_ref, wv_ref, bv_ref,
                wo_ref, bo_ref, out_ref, acc_ref, *, scale):
    # Per-grid-step views:
    #   q_ref           : (1, tq, D)
    #   k_ref / v_ref   : (1, S, D)
    #   madd_ref        : (1, 1, S)  additive mask (0 or -1e30), f32
    #   wq/wk/wv_ref    : (1, D, hd) bf16   per-head projection slice
    #   bq/bk/bv_ref    : (1, 1, hd) f32
    #   wo_ref          : (1, hd, D) bf16   per-head output-projection slice
    #   bo_ref          : (1, D)     f32
    #   acc_ref         : (tq, D)    f32 VMEM scratch, accumulated over heads
    h = pl.program_id(2)
    num_h = pl.num_programs(2)

    @pl.when(h == 0)
    def _():
        acc_ref[...] = jnp.zeros_like(acc_ref)

    x_q = q_ref[0].astype(jnp.bfloat16)          # (tq, D)
    x_k = k_ref[0].astype(jnp.bfloat16)          # (S, D)
    x_v = v_ref[0].astype(jnp.bfloat16)          # (S, D)
    madd = madd_ref[0]                           # (1, S), broadcasts over query rows

    # Per-head projections (bf16 MXU, f32 accumulate, f32 bias add).
    qh = jnp.dot(x_q, wq_ref[0], preferred_element_type=jnp.float32) + bq_ref[0]  # (tq, hd)
    kh = jnp.dot(x_k, wk_ref[0], preferred_element_type=jnp.float32) + bk_ref[0]  # (S, hd)
    vh = jnp.dot(x_v, wv_ref[0], preferred_element_type=jnp.float32) + bv_ref[0]  # (S, hd)

    # Fold the 1/sqrt(hd) scale into Q (fewer elements than scaling the scores).
    qh = qh * scale

    # Scores: contract the last axes of Q and K directly (no kh.T materialization).
    scores = jax.lax.dot_general(
        qh.astype(jnp.bfloat16), kh.astype(jnp.bfloat16),
        dimension_numbers=(((1,), (1,)), ((), ())),
        preferred_element_type=jnp.float32)                      # (tq, S)
    scores = scores + madd                                       # additive mask

    # Softmax over the key axis (f32); divide via EUP approx reciprocal.
    s_max = jnp.max(scores, axis=-1, keepdims=True)
    e = jnp.exp(scores - s_max)
    inv = pl.reciprocal(jnp.sum(e, axis=-1, keepdims=True), approx=True)
    attn = e * inv                                               # (tq, S)

    ctx = jnp.dot(attn.astype(jnp.bfloat16), vh.astype(jnp.bfloat16),
                  preferred_element_type=jnp.float32)            # (tq, hd)

    # Accumulated output projection replaces the concat: acc += ctx_h @ Wo_h.
    acc_ref[...] += jnp.dot(ctx.astype(jnp.bfloat16), wo_ref[0],
                            preferred_element_type=jnp.float32)  # (tq, D)

    @pl.when(h == num_h - 1)
    def _():
        out_ref[0] = (acc_ref[...] + bo_ref[...]).astype(out_ref.dtype)


def _pick_q_tile(S):
    for t in (512, 256, 128):
        if S % t == 0:
            return t
    return S


def multi_head_attention(query, key, value, mask, params, *, num_heads):
    """query/key/value: (B, S, D) f32, mask: (B, 1, S) or (B, 1, 1, S). Returns (B, S, D)."""
    B, S, D = query.shape
    hd = D // num_heads
    H = num_heads
    tq = _pick_q_tile(S)
    qn = S // tq

    # PyTorch Linear computes x @ W.T + b (W is (out, in)); pre-slice per head and
    # cast weights to bf16 in the wrapper (XLA glue, halves weight DMA).
    wq_h = params["wq"].T.reshape(D, H, hd).transpose(1, 0, 2).astype(jnp.bfloat16)  # (H, D, hd)
    wk_h = params["wk"].T.reshape(D, H, hd).transpose(1, 0, 2).astype(jnp.bfloat16)
    wv_h = params["wv"].T.reshape(D, H, hd).transpose(1, 0, 2).astype(jnp.bfloat16)
    wo_h = params["wo"].T.reshape(H, hd, D).astype(jnp.bfloat16)                     # (H, hd, D)
    bq_h = params["bq"].reshape(H, 1, hd).astype(jnp.float32)
    bk_h = params["bk"].reshape(H, 1, hd).astype(jnp.float32)
    bv_h = params["bv"].reshape(H, 1, hd).astype(jnp.float32)
    bo = params["bo"].reshape(1, D).astype(jnp.float32)

    # Additive mask, hoisted out of the kernel: 0 where attended, -1e30 where masked.
    mask2 = mask.reshape(B, 1, S)
    mask_add = jnp.where(mask2 == 0, jnp.float32(-1e30), jnp.float32(0.0))

    q_spec = pl.BlockSpec((1, tq, D), lambda b, qi, h: (b, qi, 0))
    kv_spec = pl.BlockSpec((1, S, D), lambda b, qi, h: (b, 0, 0))
    m_spec = pl.BlockSpec((1, 1, S), lambda b, qi, h: (b, 0, 0))
    wqkv_spec = pl.BlockSpec((1, D, hd), lambda b, qi, h: (h, 0, 0))
    bqkv_spec = pl.BlockSpec((1, 1, hd), lambda b, qi, h: (h, 0, 0))
    wo_spec = pl.BlockSpec((1, hd, D), lambda b, qi, h: (h, 0, 0))
    bo_spec = pl.BlockSpec((1, D), lambda b, qi, h: (0, 0))
    out_spec = pl.BlockSpec((1, tq, D), lambda b, qi, h: (b, qi, 0))

    kernel = partial(_mha_kernel, scale=1.0 / math.sqrt(hd))

    return pl.pallas_call(
        kernel,
        out_shape=jax.ShapeDtypeStruct((B, S, D), query.dtype),
        grid_spec=pltpu.PrefetchScalarGridSpec(
            num_scalar_prefetch=0,
            grid=(B, qn, H),                      # head axis last (reduction)
            in_specs=[q_spec, kv_spec, kv_spec, m_spec,
                      wqkv_spec, bqkv_spec, wqkv_spec, bqkv_spec,
                      wqkv_spec, bqkv_spec, wo_spec, bo_spec],
            out_specs=out_spec,
            scratch_shapes=[pltpu.VMEM((tq, D), jnp.float32)],
        ),
        compiler_params=pltpu.CompilerParams(
            dimension_semantics=("parallel", "parallel", "arbitrary"),
            vmem_limit_bytes=48 * 1024 * 1024,    # fits v7x's 64 MiB physical VMEM
        ),
    )(query, key, value, mask_add,
      wq_h, bq_h, wk_h, bk_h, wv_h, bv_h, wo_h, bo)


def _reference_mha(query, key, value, mask, params, *, num_heads):
    """Plain-JAX f32 reference mirroring the PyTorch forward (eval mode)."""
    B, S, D = query.shape
    hd = D // num_heads
    q = query @ params["wq"].T + params["bq"]
    k = key @ params["wk"].T + params["bk"]
    v = value @ params["wv"].T + params["bv"]
    q = q.reshape(B, S, num_heads, hd).transpose(0, 2, 1, 3)
    k = k.reshape(B, S, num_heads, hd).transpose(0, 2, 1, 3)
    v = v.reshape(B, S, num_heads, hd).transpose(0, 2, 1, 3)
    scores = jnp.einsum("bhqd,bhkd->bhqk", q, k) / math.sqrt(hd)
    m = mask.reshape(B, 1, 1, S)
    scores = jnp.where(m == 0, -jnp.inf, scores)
    attn = jax.nn.softmax(scores, axis=-1)
    ctx = jnp.einsum("bhqk,bhkd->bhqd", attn, v)
    ctx = ctx.transpose(0, 2, 1, 3).reshape(B, S, D)
    return ctx @ params["wo"].T + params["bo"]


def _init_params(key, d_model):
    """Deterministic Linear-style init (uniform(-1/sqrt(d), 1/sqrt(d)))."""
    ks = jax.random.split(key, 8)
    bound = 1.0 / math.sqrt(d_model)
    u = lambda k, shape: jax.random.uniform(k, shape, jnp.float32, -bound, bound)
    return {
        "wq": u(ks[0], (d_model, d_model)), "bq": u(ks[1], (d_model,)),
        "wk": u(ks[2], (d_model, d_model)), "bk": u(ks[3], (d_model,)),
        "wv": u(ks[4], (d_model, d_model)), "bv": u(ks[5], (d_model,)),
        "wo": u(ks[6], (d_model, d_model)), "bo": u(ks[7], (d_model,)),
    }


if __name__ == "__main__":
    B, S, D, H = 2, 8, 32, 4

    root = jax.random.PRNGKey(0)
    k_q, k_k, k_v, k_p = jax.random.split(root, 4)

    query = jax.random.normal(k_q, (B, S, D), jnp.float32)
    key_in = jax.random.normal(k_k, (B, S, D), jnp.float32)
    value = jax.random.normal(k_v, (B, S, D), jnp.float32)

    # mask: (B, 1, S); last two key positions of batch 1 are padding.
    mask = jnp.ones((B, 1, S), jnp.float32)
    mask = mask.at[1, 0, S - 2:].set(0.0)

    params = _init_params(k_p, D)

    out = multi_head_attention(query, key_in, value, mask, params, num_heads=H)
    out = jax.block_until_ready(out)

    ref = _reference_mha(query, key_in, value, mask, params, num_heads=H)
    assert out.shape == (B, S, D)
    # bf16 MXU inputs with f32 accumulation -> compare at slightly relaxed tolerance.
    assert jnp.allclose(out, ref, rtol=2e-2, atol=2e-2), "mismatch vs reference"

    print("KERNEL_OK")
</pallas_src>

<mosaic_0001>
module attributes {stable_mosaic.version = 11 : i64} {
  func.func @_mha_kernel(%arg0: i32, %arg1: i32, %arg2: i32, %arg3: memref<1x8x32xf32, #tpu.memory_space<vmem>>, %arg4: memref<1x8x32xf32, #tpu.memory_space<vmem>>, %arg5: memref<1x8x32xf32, #tpu.memory_space<vmem>>, %arg6: memref<1x1x8xf32, #tpu.memory_space<vmem>>, %arg7: memref<1x32x8xbf16, #tpu.memory_space<vmem>>, %arg8: memref<1x1x8xf32, #tpu.memory_space<vmem>>, %arg9: memref<1x32x8xbf16, #tpu.memory_space<vmem>>, %arg10: memref<1x1x8xf32, #tpu.memory_space<vmem>>, %arg11: memref<1x32x8xbf16, #tpu.memory_space<vmem>>, %arg12: memref<1x1x8xf32, #tpu.memory_space<vmem>>, %arg13: memref<1x8x32xbf16, #tpu.memory_space<vmem>>, %arg14: memref<1x32xf32, #tpu.memory_space<vmem>>, %arg15: memref<1x8x32xf32, #tpu.memory_space<vmem>>, %arg16: memref<8x32xf32, #tpu.memory_space<vmem>>) attributes {dimension_semantics = [#tpu.dimension_semantics<parallel>, #tpu.dimension_semantics<parallel>, #tpu.dimension_semantics<arbitrary>], iteration_bounds = array<i64: 2, 1, 4>, scalar_prefetch = 0 : i64, scratch_operands = 1 : i64, tpu.core_type = #tpu.core_type<tc>, window_params = [{transform_indices = @transform_0, window_bounds = array<i64: 1, 8, 32>}, {transform_indices = @transform_1, window_bounds = array<i64: 1, 8, 32>}, {transform_indices = @transform_2, window_bounds = array<i64: 1, 8, 32>}, {transform_indices = @transform_3, window_bounds = array<i64: 1, 1, 8>}, {transform_indices = @transform_4, window_bounds = array<i64: 1, 32, 8>}, {transform_indices = @transform_5, window_bounds = array<i64: 1, 1, 8>}, {transform_indices = @transform_6, window_bounds = array<i64: 1, 32, 8>}, {transform_indices = @transform_7, window_bounds = array<i64: 1, 1, 8>}, {transform_indices = @transform_8, window_bounds = array<i64: 1, 32, 8>}, {transform_indices = @transform_9, window_bounds = array<i64: 1, 1, 8>}, {transform_indices = @transform_10, window_bounds = array<i64: 1, 8, 32>}, {pipeline_mode = #tpu.pipeline_mode<synchronous>, transform_indices = @transform_11, window_bounds = array<i64: 1, 32>}, {transform_indices = @transform_12, window_bounds = array<i64: 1, 8, 32>}]} {
    %c0_i32 = arith.constant 0 : i32
    %0 = arith.cmpi eq, %arg2, %c0_i32 : i32
    %1 = arith.extui %0 : i1 to i32
    %c0_i32_0 = arith.constant 0 : i32
    %2 = arith.cmpi ne, %1, %c0_i32_0 : i32
    scf.if %2 {
      %cst_46 = arith.constant 0.000000e+00 : f32
      %65 = vector.broadcast %cst_46 : f32 to vector<8x32xf32>
      %c0_47 = arith.constant 0 : index
      %c0_48 = arith.constant 0 : index
      %66 = vector.load %arg16[%c0_47, %c0_48] : memref<8x32xf32, #tpu.memory_space<vmem>>, vector<8x32xf32>
      tpu.vector_store %arg16[%c0_47, %c0_48], %65 {strides = array<i32>} : memref<8x32xf32, #tpu.memory_space<vmem>>, vector<8x32xf32>,
    } else {
    }
    %c0 = arith.constant 0 : index
    %c0_1 = arith.constant 0 : index
    %c0_2 = arith.constant 0 : index
    %3 = vector.load %arg3[%c0, %c0_1, %c0_2] : memref<1x8x32xf32, #tpu.memory_space<vmem>>, vector<1x8x32xf32>
    %4 = vector.shape_cast %3 : vector<1x8x32xf32> to vector<8x32xf32>
    %5 = arith.truncf %4 : vector<8x32xf32> to vector<8x32xbf16>
    %c0_3 = arith.constant 0 : index
    %c0_4 = arith.constant 0 : index
    %c0_5 = arith.constant 0 : index
    %6 = vector.load %arg4[%c0_3, %c0_4, %c0_5] : memref<1x8x32xf32, #tpu.memory_space<vmem>>, vector<1x8x32xf32>
    %7 = vector.shape_cast %6 : vector<1x8x32xf32> to vector<8x32xf32>
    %8 = arith.truncf %7 : vector<8x32xf32> to vector<8x32xbf16>
    %c0_6 = arith.constant 0 : index
    %c0_7 = arith.constant 0 : index
    %c0_8 = arith.constant 0 : index
    %9 = vector.load %arg5[%c0_6, %c0_7, %c0_8] : memref<1x8x32xf32, #tpu.memory_space<vmem>>, vector<1x8x32xf32>
    %10 = vector.shape_cast %9 : vector<1x8x32xf32> to vector<8x32xf32>
    %11 = arith.truncf %10 : vector<8x32xf32> to vector<8x32xbf16>
    %c0_9 = arith.constant 0 : index
    %c0_10 = arith.constant 0 : index
    %c0_11 = arith.constant 0 : index
    %12 = vector.load %arg6[%c0_9, %c0_10, %c0_11] : memref<1x1x8xf32, #tpu.memory_space<vmem>>, vector<1x1x8xf32>
    %13 = vector.shape_cast %12 : vector<1x1x8xf32> to vector<1x8xf32>
    %c0_12 = arith.constant 0 : index
    %c0_13 = arith.constant 0 : index
    %c0_14 = arith.constant 0 : index
    %14 = vector.load %arg7[%c0_12, %c0_13, %c0_14] : memref<1x32x8xbf16, #tpu.memory_space<vmem>>, vector<1x32x8xbf16>
    %15 = vector.shape_cast %14 : vector<1x32x8xbf16> to vector<32x8xbf16>
    %cst = arith.constant dense<0.000000e+00> : vector<8x8xf32>
    %16 = tpu.matmul %5, %15, %cst {dimension_numbers = #tpu.dot_dimension_numbers<[1], [0], [0], [1], [0, 0, 1, 1], [], []>} : vector<8x32xbf16>, vector<32x8xbf16>, vector<8x8xf32> -> vector<8x8xf32>
    %c0_15 = arith.constant 0 : index
    %c0_16 = arith.constant 0 : index
    %c0_17 = arith.constant 0 : index
    %17 = vector.load %arg8[%c0_15, %c0_16, %c0_17] : memref<1x1x8xf32, #tpu.memory_space<vmem>>, vector<1x1x8xf32>
    %18 = vector.shape_cast %17 : vector<1x1x8xf32> to vector<1x8xf32>
    %19 = vector.broadcast %18 : vector<1x8xf32> to vector<8x8xf32>
    %20 = arith.addf %16, %19 : vector<8x8xf32>
    %c0_18 = arith.constant 0 : index
    %c0_19 = arith.constant 0 : index
    %c0_20 = arith.constant 0 : index
    %21 = vector.load %arg9[%c0_18, %c0_19, %c0_20] : memref<1x32x8xbf16, #tpu.memory_space<vmem>>, vector<1x32x8xbf16>
    %22 = vector.shape_cast %21 : vector<1x32x8xbf16> to vector<32x8xbf16>
    %cst_21 = arith.constant dense<0.000000e+00> : vector<8x8xf32>
    %23 = tpu.matmul %8, %22, %cst_21 {dimension_numbers = #tpu.dot_dimension_numbers<[1], [0], [0], [1], [0, 0, 1, 1], [], []>} : vector<8x32xbf16>, vector<32x8xbf16>, vector<8x8xf32> -> vector<8x8xf32>
    %c0_22 = arith.constant 0 : index
    %c0_23 = arith.constant 0 : index
    %c0_24 = arith.constant 0 : index
    %24 = vector.load %arg10[%c0_22, %c0_23, %c0_24] : memref<1x1x8xf32, #tpu.memory_space<vmem>>, vector<1x1x8xf32>
    %25 = vector.shape_cast %24 : vector<1x1x8xf32> to vector<1x8xf32>
    %26 = vector.broadcast %25 : vector<1x8xf32> to vector<8x8xf32>
    %27 = arith.addf %23, %26 : vector<8x8xf32>
    %c0_25 = arith.constant 0 : index
    %c0_26 = arith.constant 0 : index
    %c0_27 = arith.constant 0 : index
    %28 = vector.load %arg11[%c0_25, %c0_26, %c0_27] : memref<1x32x8xbf16, #tpu.memory_space<vmem>>, vector<1x32x8xbf16>
    %29 = vector.shape_cast %28 : vector<1x32x8xbf16> to vector<32x8xbf16>
    %cst_28 = arith.constant dense<0.000000e+00> : vector<8x8xf32>
    %30 = tpu.matmul %11, %29, %cst_28 {dimension_numbers = #tpu.dot_dimension_numbers<[1], [0], [0], [1], [0, 0, 1, 1], [], []>} : vector<8x32xbf16>, vector<32x8xbf16>, vector<8x8xf32> -> vector<8x8xf32>
    %c0_29 = arith.constant 0 : index
    %c0_30 = arith.constant 0 : index
    %c0_31 = arith.constant 0 : index
    %31 = vector.load %arg12[%c0_29, %c0_30, %c0_31] : memref<1x1x8xf32, #tpu.memory_space<vmem>>, vector<1x1x8xf32>
    %32 = vector.shape_cast %31 : vector<1x1x8xf32> to vector<1x8xf32>
    %33 = vector.broadcast %32 : vector<1x8xf32> to vector<8x8xf32>
    %34 = arith.addf %30, %33 : vector<8x8xf32>
    %cst_32 = arith.constant 0.353553385 : f32
    %35 = vector.broadcast %cst_32 : f32 to vector<8x8xf32>
    %36 = arith.mulf %20, %35 : vector<8x8xf32>
    %37 = arith.truncf %36 : vector<8x8xf32> to vector<8x8xbf16>
    %38 = arith.truncf %27 : vector<8x8xf32> to vector<8x8xbf16>
    %cst_33 = arith.constant dense<0.000000e+00> : vector<8x8xf32>
    %39 = tpu.matmul %37, %38, %cst_33 {dimension_numbers = #tpu.dot_dimension_numbers<[1], [1], [0], [0], [0, 0, 1, 0], [], []>} : vector<8x8xbf16>, vector<8x8xbf16>, vector<8x8xf32> -> vector<8x8xf32>
    %40 = vector.broadcast %13 : vector<1x8xf32> to vector<8x8xf32>
    %41 = arith.addf %39, %40 : vector<8x8xf32>
    %cst_34 = arith.constant dense<0xFF800000> : vector<8xf32>
    %42 = vector.multi_reduction <maximumf>, %41, %cst_34 [1] : vector<8x8xf32> to vector<8xf32>
    %43 = vector.shape_cast %42 : vector<8xf32> to vector<8x1xf32>
    %44 = vector.broadcast %43 : vector<8x1xf32> to vector<8x8xf32>
    %45 = arith.subf %41, %44 : vector<8x8xf32>
    %46 = math.exp %45 : vector<8x8xf32>
    %cst_35 = arith.constant dense<0.000000e+00> : vector<8xf32>
    %47 = vector.multi_reduction <add>, %46, %cst_35 [1] : vector<8x8xf32> to vector<8xf32>
    %48 = vector.shape_cast %47 : vector<8xf32> to vector<8x1xf32>
    %49 = tpu.reciprocal %48 {approx = true} : vector<8x1xf32> -> vector<8x1xf32>
    %50 = vector.broadcast %49 : vector<8x1xf32> to vector<8x8xf32>
    %51 = arith.mulf %46, %50 : vector<8x8xf32>
    %52 = arith.truncf %51 : vector<8x8xf32> to vector<8x8xbf16>
    %53 = arith.truncf %34 : vector<8x8xf32> to vector<8x8xbf16>
    %cst_36 = arith.constant dense<0.000000e+00> : vector<8x8xf32>
    %54 = tpu.matmul %52, %53, %cst_36 {dimension_numbers = #tpu.dot_dimension_numbers<[1], [0], [0], [1], [0, 0, 1, 1], [], []>} : vector<8x8xbf16>, vector<8x8xbf16>, vector<8x8xf32> -> vector<8x8xf32>
    %c0_37 = arith.constant 0 : index
    %c0_38 = arith.constant 0 : index
    %55 = vector.load %arg16[%c0_37, %c0_38] : memref<8x32xf32, #tpu.memory_space<vmem>>, vector<8x32xf32>
    %56 = arith.truncf %54 : vector<8x8xf32> to vector<8x8xbf16>
    %c0_39 = arith.constant 0 : index
    %c0_40 = arith.constant 0 : index
    %c0_41 = arith.constant 0 : index
    %57 = vector.load %arg13[%c0_39, %c0_40, %c0_41] : memref<1x8x32xbf16, #tpu.memory_space<vmem>>, vector<1x8x32xbf16>
    %58 = vector.shape_cast %57 : vector<1x8x32xbf16> to vector<8x32xbf16>
    %cst_42 = arith.constant dense<0.000000e+00> : vector<8x32xf32>
    %59 = tpu.matmul %56, %58, %cst_42 {dimension_numbers = #tpu.dot_dimension_numbers<[1], [0], [0], [1], [0, 0, 1, 1], [], []>} : vector<8x8xbf16>, vector<8x32xbf16>, vector<8x32xf32> -> vector<8x32xf32>
    %60 = arith.addf %55, %59 : vector<8x32xf32>
    %c0_43 = arith.constant 0 : index
    %c0_44 = arith.constant 0 : index
    %61 = vector.load %arg16[%c0_43, %c0_44] : memref<8x32xf32, #tpu.memory_space<vmem>>, vector<8x32xf32>
    tpu.vector_store %arg16[%c0_43, %c0_44], %60 {strides = array<i32>} : memref<8x32xf32, #tpu.memory_space<vmem>>, vector<8x32xf32>,
    %c3_i32 = arith.constant 3 : i32
    %62 = arith.cmpi eq, %arg2, %c3_i32 : i32
    %63 = arith.extui %62 : i1 to i32
    %c0_i32_45 = arith.constant 0 : i32
    %64 = arith.cmpi ne, %63, %c0_i32_45 : i32
    scf.if %64 {
      %c0_46 = arith.constant 0 : index
      %c0_47 = arith.constant 0 : index
      %65 = vector.load %arg16[%c0_46, %c0_47] : memref<8x32xf32, #tpu.memory_space<vmem>>, vector<8x32xf32>
      %c0_48 = arith.constant 0 : index
      %c0_49 = arith.constant 0 : index
      %66 = vector.load %arg14[%c0_48, %c0_49] : memref<1x32xf32, #tpu.memory_space<vmem>>, vector<1x32xf32>
      %67 = vector.broadcast %66 : vector<1x32xf32> to vector<8x32xf32>
      %68 = arith.addf %65, %67 : vector<8x32xf32>
      %c0_50 = arith.constant 0 : index
      %c0_51 = arith.constant 0 : index
      %c0_52 = arith.constant 0 : index
      %69 = vector.load %arg15[%c0_50, %c0_51, %c0_52] : memref<1x8x32xf32, #tpu.memory_space<vmem>>, vector<1x8x32xf32>
      %70 = vector.shape_cast %69 : vector<1x8x32xf32> to vector<8x32xf32>
      %71 = vector.shape_cast %68 : vector<8x32xf32> to vector<1x8x32xf32>
      tpu.vector_store %arg15[%c0_50, %c0_51, %c0_52], %71 {strides = array<i32>} : memref<1x8x32xf32, #tpu.memory_space<vmem>>, vector<1x8x32xf32>,
    } else {
    }
    return
  }
  func.func @transform_0(%arg0: i32, %arg1: i32, %arg2: i32) -> (i32, i32, i32) {
    %c0_i32 = arith.constant 0 : i32
    %c0_i32_0 = arith.constant 0 : i32
    return %arg0, %arg1, %c0_i32 : i32, i32, i32
  }
  func.func @transform_1(%arg0: i32, %arg1: i32, %arg2: i32) -> (i32, i32, i32) {
    %c0_i32 = arith.constant 0 : i32
    %c0_i32_0 = arith.constant 0 : i32
    %c0_i32_1 = arith.constant 0 : i32
    return %arg0, %c0_i32, %c0_i32_0 : i32, i32, i32
  }
  func.func @transform_2(%arg0: i32, %arg1: i32, %arg2: i32) -> (i32, i32, i32) {
    %c0_i32 = arith.constant 0 : i32
    %c0_i32_0 = arith.constant 0 : i32
    %c0_i32_1 = arith.constant 0 : i32
    return %arg0, %c0_i32, %c0_i32_0 : i32, i32, i32
  }
  func.func @transform_3(%arg0: i32, %arg1: i32, %arg2: i32) -> (i32, i32, i32) {
    %c0_i32 = arith.constant 0 : i32
    %c0_i32_0 = arith.constant 0 : i32
    %c0_i32_1 = arith.constant 0 : i32
    return %arg0, %c0_i32, %c0_i32_0 : i32, i32, i32
  }
  func.func @transform_4(%arg0: i32, %arg1: i32, %arg2: i32) -> (i32, i32, i32) {
    %c0_i32 = arith.constant 0 : i32
    %c0_i32_0 = arith.constant 0 : i32
    %c0_i32_1 = arith.constant 0 : i32
    return %arg2, %c0_i32, %c0_i32_0 : i32, i32, i32
  }
  func.func @transform_5(%arg0: i32, %arg1: i32, %arg2: i32) -> (i32, i32, i32) {
    %c0_i32 = arith.constant 0 : i32
    %c0_i32_0 = arith.constant 0 : i32
    %c0_i32_1 = arith.constant 0 : i32
    return %arg2, %c0_i32, %c0_i32_0 : i32, i32, i32
  }
  func.func @transform_6(%arg0: i32, %arg1: i32, %arg2: i32) -> (i32, i32, i32) {
    %c0_i32 = arith.constant 0 : i32
    %c0_i32_0 = arith.constant 0 : i32
    %c0_i32_1 = arith.constant 0 : i32
    return %arg2, %c0_i32, %c0_i32_0 : i32, i32, i32
  }
  func.func @transform_7(%arg0: i32, %arg1: i32, %arg2: i32) -> (i32, i32, i32) {
    %c0_i32 = arith.constant 0 : i32
    %c0_i32_0 = arith.constant 0 : i32
    %c0_i32_1 = arith.constant 0 : i32
    return %arg2, %c0_i32, %c0_i32_0 : i32, i32, i32
  }
  func.func @transform_8(%arg0: i32, %arg1: i32, %arg2: i32) -> (i32, i32, i32) {
    %c0_i32 = arith.constant 0 : i32
    %c0_i32_0 = arith.constant 0 : i32
    %c0_i32_1 = arith.constant 0 : i32
    return %arg2, %c0_i32, %c0_i32_0 : i32, i32, i32
  }
  func.func @transform_9(%arg0: i32, %arg1: i32, %arg2: i32) -> (i32, i32, i32) {
    %c0_i32 = arith.constant 0 : i32
    %c0_i32_0 = arith.constant 0 : i32
    %c0_i32_1 = arith.constant 0 : i32
    return %arg2, %c0_i32, %c0_i32_0 : i32, i32, i32
  }
  func.func @transform_10(%arg0: i32, %arg1: i32, %arg2: i32) -> (i32, i32, i32) {
    %c0_i32 = arith.constant 0 : i32
    %c0_i32_0 = arith.constant 0 : i32
    %c0_i32_1 = arith.constant 0 : i32
    return %arg2, %c0_i32, %c0_i32_0 : i32, i32, i32
  }
  func.func @transform_11(%arg0: i32, %arg1: i32, %arg2: i32) -> (i32, i32) {
    %c0_i32 = arith.constant 0 : i32
    %c0_i32_0 = arith.constant 0 : i32
    %c0_i32_1 = arith.constant 0 : i32
    return %c0_i32, %c0_i32_0 : i32, i32
  }
  func.func @transform_12(%arg0: i32, %arg1: i32, %arg2: i32) -> (i32, i32, i32) {
    %c0_i32 = arith.constant 0 : i32
    %c0_i32_0 = arith.constant 0 : i32
    return %arg0, %arg1, %c0_i32 : i32, i32, i32
  }
}

</mosaic_0001>

<bundles_post_ra>
// kernel: tpu_custom_call.1
= control target key start
LH: loop header
LB: loop body
LE: loop exit
PB: predicated region body
PF: predicated region fallthrough
CT: control target
= control target key end

     0   :  { %s1794_s0 = inlined_call_operand.vmem [shape: f32[2,8,32], index: 0, kind: input, shape index: {}]   ;;  %s1795_s1 = inlined_call_operand.vmem [shape: f32[2,8,32], index: 1, kind: input, shape index: {}]   ;;  %s1796_s2 = inlined_call_operand.vmem [shape: f32[2,8,32], index: 2, kind: input, shape index: {}]   ;;  %s1797_s3 = inlined_call_operand.vmem [shape: f32[2,1,8], index: 3, kind: input, shape index: {}]   ;;  %s1798_s4 = inlined_call_operand.vmem [shape: bf16[4,32,8], index: 4, kind: input, shape index: {}]   ;;  %s1799_s5 = inlined_call_operand.vmem [shape: f32[4,1,8], index: 5, kind: input, shape index: {}]   ;;  %s1800_s6 = inlined_call_operand.vmem [shape: bf16[4,32,8], index: 6, kind: input, shape index: {}]   ;;  %s1801_s7 = inlined_call_operand.vmem [shape: f32[4,1,8], index: 7, kind: input, shape index: {}]   ;;  %s1802_s8 = inlined_call_operand.vmem [shape: bf16[4,32,8], index: 8, kind: input, shape index: {}]   ;;  %s1803_s9 = inlined_call_operand.vmem [shape: f32[4,1,8], index: 9, kind: input, shape index: {}]   ;;  %s1804_s10 = inlined_call_operand.vmem [shape: bf16[4,8,32], index: 10, kind: input, shape index: {}]   ;;  %s1805_s11 = inlined_call_operand.vmem [shape: f32[1,32], index: 11, kind: input, shape index: {}]   ;;  %s1806_s12 = inlined_call_operand.hbm [shape: f32[2,8,32], index: 12, kind: output, shape index: {}]  }
   0x1   :  { %1822 = sst [smem:[#allocation19_spill]] %s1795_s1 }
   0x2   :  { %1823 = sst [smem:[#allocation20_spill]] %s1797_s3 }
   0x3   :  { %1824 = sst [smem:[#allocation21_spill]] %s1798_s4 }
   0x4   :  { %1825 = sst [smem:[#allocation22_spill]] %s1805_s11 }
   0x5   :  { %1826 = sst [smem:[#allocation23_spill]] %s1806_s12 }
   0x6   :  { %17 = vsyncpa [#allocation4], 0 }
   0x7   :  { %19 = vsyncpa [#allocation4 + $0x1], 0  ;;  %s1550_s21 = smov 0   ;;  %s1552_s22 = smov 0  }
   0x8   :  { %s1554_s23 = smov 0   ;;  %s1556_s24 = smov 0  }
   0x9   :  { %s1558_s25 = smov 0   ;;  %s1560_s26 = smov 0  }
   0xa   :  { %s1562_s27 = smov 0   ;;  %s1564_s28 = smov 0  }
   0xb LB: > { %1827 = sst [smem:[#allocation6_spill]] %s1451_s21  ;;  %s1202_s29 = sadd.s32 4294967295, %s1479_s28   ;;  %s1479_s28 = sphi %s1564_s28, %s25_s28   ;;  %s1475_s27 = sphi %s1562_s27, %s1867_s27   ;;  %s1471_s26 = sphi %s1560_s26, %s1866_s26   ;;  %s1467_s25 = sphi %s1558_s25, %s1865_s25   ;;  %s1463_s24 = sphi %s1556_s24, %s1864_s24   ;;  %s1459_s23 = sphi %s1554_s23, %s1863_s23   ;;  %s1455_s22 = sphi %s1552_s22, %s1862_s22   ;;  %s1451_s21 = sphi %s1550_s21, %s1861_s21  }
   0xc   : > { %1828 = sst [smem:[#allocation7_spill]] %s1455_s22  ;;  %s1203_s30 = sadd.s32 4294967294, %s1479_s28  }
   0xd   : > { %1829 = sst [smem:[#allocation8_spill]] %s1459_s23  ;;  %s37_s13 = sadd.s32 1, %s1471_s26 }
   0xe   : > { %1830 = sst [smem:[#allocation9_spill]] %s1463_s24  ;;  %p38_p0 = scmp.ge.s32.totalorder %s37_s13, 4 }
   0xf   : > { %1831 = sst [smem:[#allocation10_spill]] %s1467_s25  ;;  %s44_s14 = sadd.s32 1, %s1475_s27 }
  0x10   : > { %1832 = sst [smem:[#allocation11_spill]] %s1471_s26  ;;  %p372_p1 = scmp.ne.s32.totalorder %s1459_s23, %s1455_s22 }
  0x11   : > { %1833 = sst [smem:[#allocation12_spill]] %s1475_s27  ;;  %p373_p2 = scmp.eq.s32.totalorder %s1202_s29, 7 }
  0x12   : > { %1834 = sst [smem:[#allocation13_spill]] %s1479_s28  ;;  %s1869_s13 = smov (%p38_p0, %s37_s13), 0 }
  0x13   : > { %1835 = sst [smem:[#allocation14_spill]] %s1869_s13  ;;  %s1871_s14 = smov (!%p38_p0, %s44_s14), %s1475_s27 }
  0x14   : > { %p1599_p3 = por %p373_p2, %p372_p1  ;;  %p378_p4 = scmp.ne.s32.totalorder %s1455_s22, %s1451_s21 }
  0x15   : > { %p46_p5 = scmp.ge.s32.totalorder %s1871_s14, 2  ;;  %p379_p6 = scmp.eq.s32.totalorder %s1203_s30, 7 }
  0x16   : > { %s1836_s15 = scalar_select %p1599_p3, 1, 0 }
  0x17   : > { %p1206_p7 = scmp.ge.s32.totalorder %s1479_s28, 1  ;;  %p479_p8 = scmp.lt.s32.totalorder %s1479_s28, 9 }
  0x18   : > { %1837 = sst [smem:[#allocation15_spill]] %s1836_s15  ;;  %s1873_s14 = smov (%p46_p5, %s1871_s14), 0 }
  0x19   : > { %1838 = sst [smem:[#allocation16_spill]] %s1873_s14  ;;  %p1609_p9 = por %p379_p6, %p378_p4 }
  0x1a   : > { %p480_p10 = pnand %p1206_p7, %p479_p8  ;;  %s357_s17 = ssub.s32 %s1475_s27, %s1873_s14 }
  0x1b   : > { %s1839_s16 = scalar_select %p1609_p9, 1, 0 }
  0x1c   : > { %s362_s18 = sadd.s32 1, %s1459_s23  ;;  %p360_p11 = scmp.eq.s32.totalorder %s357_s17, 0 }
  0x1d   : > { %1840 = sst [smem:[#allocation17_spill]] %s1839_s16  ;;  %483 = sbr.rel (%p480_p10) target bundleno = 1279 (0x4ff), region = 68 }
  0x1e   : > { %s1617_s19 = scalar_select %p360_p11, %s1459_s23, %s362_s18  }
  0x1f   : > { %s1808_s20 = sand.u32 (!%p480_p10), 1, %s1455_s22   ;;  %p562_p12 = scmp.lt.s32.totalorder (!%p480_p10), %s1467_s25, 1 }
  0x20   : > { %1841 = sst [smem:[#allocation18_spill]] %s1617_s19  ;;  %s1623_s29 = sshll.u32 (!%p480_p10), %s1808_s20, 3 }
  0x21   : > { %p580_p13 = scmp.lt.s32.totalorder (!%p480_p10), %s1463_s24, 3  ;;  %s1843_s1 = sld [smem:[#allocation19_spill]] (!%p480_p10) }
  0x22   : > { %s1844_s4 = sld [smem:[#allocation21_spill]] (!%p480_p10)  ;;  %s561_s3 = scalar_lea.vmem (!%p480_p10), [#allocation3], %s1623_s29 }
  0x23   : > { %s1845_s26 = sld [smem:[#allocation9_spill]] (!%p480_p10) }
  0x24   : > { %s1627_s30 = scalar_select %p562_p12, %s1467_s25, 1 }
  0x25   : > { %s1630_s17 = scalar_select %p580_p13, %s1463_s24, 3 }
  0x26   : > { %s1633_s18 = sshll.u32 %s1627_s30, 3 }
  0x27   : > { %s572_s21 = scalar_lea.vmem %s1843_s1, %s1633_s18  ;;  %s1241_s22 = sshll.u32 %s1630_s17, 4 }
  0x28   : > { %s584_s13 = scalar_lea.vmem %s1844_s4, %s1241_s22  ;;  %s592_s27 = scalar_lea.vmem %s1800_s6, %s1241_s22 }
  0x29   : > { %s595_s16 = scalar_lea.vmem %s1801_s7, %s1630_s17  ;;  %s1669_s28 = scalar_lea.vmem %s1802_s8, %s1241_s22 }
  0x2a   : > { %s603_s25 = scalar_lea.vmem %s1803_s9, %s1630_s17  ;;  %s1217_s4 = sshll.u32 %s1630_s17, 2 }
  0x2b   : > { %s1679_s20 = scalar_lea.vmem %s1804_s10, %s1217_s4  ;;  %p1218_p0 = scmp.ne.s32.totalorder %s1845_s26, 0 }
  0x2c   : > { %vm613_vm0 = vcmask (!%p1218_p0), 261120   ;;  %v1481_v0 = vmov (!%p1218_p0), 0.0  }
  0x2d   : > { %612 = sbr.rel (%p1218_p0) target bundleno = 52 (0x34), region = 72  ;;  %614 = vst.msk [vmem:[#allocation2] sm:$0xff] (!%p1218_p0), %vm613_vm0, %v1481_v0 }
  0x34 PF: > { %v1375_v1 = vld [vmem:[%s592_s27] sm:$0xff]   ;;  %v1482_v2 = vmov 0.0   ;;  %v1377_v4 = vld [vmem:[%s592_s27 + $0x8] sm:$0xff]   ;;  %vm1483_vm1 = vmmov 0   ;;  %s1846_s22 = scalar_lea.vmem %s1794_s0, %s1633_s18  ;;  %vm645_vm2 = vcmask 261120   ;;  %s1847_s27 = scalar_lea.vmem %s1799_s5, %s1630_s17  ;;  %vm830_vm3 = vcmask 64512  }
  0x35   : > { %1267 = vmatprep.subr.bf16.mxu1 %v1482_v2  ;;  %1259 = vmatprep.subr.bf16.mxu0 %v1482_v2  ;;  %v1376_v3 = vld [vmem:[%s584_s13] sm:$0xff]   ;;  %v1378_v6 = vld [vmem:[%s584_s13 + $0x8] sm:$0xff]   ;;  %s1848_s12 = scalar_lea.vmem %s1796_s2, %s1633_s18  ;;  %s1849_s14 = sld [smem:[#allocation20_spill]]  ;;  %vm893_vm4 = vcmask 1043456  }
  0x36   : > { %1268 = vmatpush3.bf16.msra.mxu1 %v1375_v1  ;;  %1271 = vmatprep.mubr.msk.bf16.mxu1 %vm1483_vm1, %v1482_v2  ;;  %v617_v5 = vld [vmem:[%s572_s21] sm:$0xff]  ;;  %v1380_v27 = vld [vmem:[%s1669_s28 + $0x8] sm:$0xff]  }
  0x37   : > { %1269 = vmatprep.subr.bf16.mxu1 %v1482_v2  ;;  %1260 = vmatpush3.bf16.msra.mxu0 %v1376_v3  ;;  %v615_v7 = vld [vmem:[%s1846_s22] sm:$0xff]  ;;  %v618_v8 = vpack.c.bf16 %v617_v5, %v617_v5 }
  0x38   : > { %1261 = vmatprep.subr.bf16.mxu0 %v1482_v2  ;;  %1263 = vmatprep.mubr.msk.bf16.mxu0 %vm1483_vm1, %v1482_v2  ;;  %v616_v9 = vpack.c.bf16 %v615_v7, %v615_v7  ;;  %v1223_v10 = vld [vmem:[%s595_s16] ss:$0 sm:$0xff] }
  0x39   : > { %v1219_v11 = vld [vmem:[%s1847_s27] ss:$0 sm:$0xff] }
  0x3a   : > { %1270 = vmatpush3.bf16.msra.mxu1 %v1377_v4  ;;  %v1379_v26 = vld [vmem:[%s1669_s28] sm:$0xff]  }
  0x3b   : > { %1262 = vmatpush3.bf16.msra.mxu0 %v1378_v6  ;;  %1283 = vmatprep.subr.bf16.mxu1 %v1482_v2  ;;  %v619_v28 = vld [vmem:[%s1848_s12] sm:$0xff]  ;;  %s1850_s26 = scalar_lea.vmem %s1849_s14, %s1627_s30 }
  0x3c   : > { %1275 = vmatprep.subr.bf16.mxu0 %v1482_v2  ;;  %v620_v29 = vpack.c.bf16 %v619_v28, %v619_v28  ;;  %v1231_v30 = vld [vmem:[%s1850_s26] ss:$0 sm:$0xff] }
  0x3d   : > { %1272 = vmatmul.mubr.msk.bf16.vlgmr.msra.gmra.mrb[0].mxu1 %vm645_vm2, %v618_v8  ;;  %v1227_v45 = vld [vmem:[%s603_s25] ss:$0 sm:$0xff] }
  0x3e   : > { %1264 = vmatmul.mubr.msk.bf16.vlgmr.msra.gmra.mrb[0].mxu0 %vm645_vm2, %v616_v9  ;;  %1285 = vmatprep.mubr.msk.bf16.mxu1 %vm1483_vm1, %v1482_v2  ;;  %v939_v50 = vld [vmem:[%s1679_s20] sm:$0xf]  ;;  %s1851_s20 = sld [smem:[#allocation9_spill]] }
  0x3f   : > { %1279 = vmatprep.mubr.msk.bf16.mxu0 %vm1483_vm1, %v1482_v2  ;;  %1276 = vmatpush3.bf16.msra.mxu0 %v1379_v26  ;;  %v944_v51 = vsel %vm893_vm4, %v939_v50, 0  ;;  %v937_v61 = vld [vmem:[#allocation2] sm:$0xff] }
  0x40   : > { %1277 = vmatprep.subr.bf16.mxu0 %v1482_v2 }
  0x43   : > { %1278 = vmatpush3.bf16.msra.mxu0 %v1380_v27 }
  0x44   : > { %1289 = vmatprep.subr.bf16.mxu0 %v1482_v2  ;;  %p1235_p1 = scmp.ne.s32.totalorder %s1851_s20, 3 }
  0x45   : > { %s1852_s25 = sld [smem:[#allocation22_spill]] (!%p1235_p1) }
  0x46   : > { %1280 = vmatmul.mubr.msk.bf16.vlgmr.msra.gmra.mrb[4].mxu0 %vm645_vm2, %v620_v29 }
  0x47   : > { %1291 = vmatprep.mubr.msk.bf16.mxu0 %vm1483_vm1, %v1482_v2 }
  0x4b   : > { %v1236_v4 = vld [vmem:[%s1852_s25] ss:$0 sm:$0xff] (!%p1235_p1) }
 0x110   : > { %v749_v12 = vpop.f32.mrb[0].mxu1 }
 0x111   : > { %v750_v13 = vadd.f32 %v1223_v10, %v749_v12  ;;  %v1273_v14 = vpop.f32.mrb[1].mxu1  ;;  %v683_v15 = vpop.f32.mrb[0].mxu0 }
 0x112   : > { %v752_v16 = vpop.f32.mrb[2].mxu1  ;;  %v684_v17 = vadd.f32 %v1219_v11, %v683_v15  ;;  %v1265_v18 = vpop.f32.mrb[1].mxu0 }
 0x113   : > { %v823_v19 = vpack.c.bf16 %v750_v13, %v750_v13  ;;  %v1274_v20 = vpop.f32.mrb[3].mxu1  ;;  %v686_v21 = vpop.f32.mrb[2].mxu0 }
 0x114   : > { %v1266_v22 = vpop.f32.mrb[3].mxu0  ;;  %v821_v24 = vmul.f32 0.35355338, %v684_v17 }
 0x115   : > { %v835_v23 = vsel %vm830_vm3, %v823_v19, 0 }
 0x116   : > { %1284 = vmatpush3.bf16.xpose.msra.mxu1 %v835_v23  ;;  %v822_v25 = vpack.c.bf16 %v821_v24, %v821_v24 }
 0x117   : > { %1295 = vmatprep.subr.bf16.mxu1 %v1482_v2 }
 0x119   : > { %v815_v42 = vpop.f32.mrb[4].mxu0 }
 0x11a   : > { %v1281_v43 = vpop.f32.mrb[5].mxu0  ;;  %v816_v47 = vadd.f32 %v1227_v45, %v815_v42 }
 0x11b   : > { %v818_v44 = vpop.f32.mrb[6].mxu0 }
 0x11c   : > { %v1282_v46 = vpop.f32.mrb[7].mxu0  ;;  %v889_v48 = vpack.c.bf16 %v816_v47, %v816_v47 }
 0x11d   : > { %1286 = vmatmul.mubr.msk.bf16.vlgmr.msra.gmra.mrb[4].mxu1 %vm830_vm3, %v822_v25 }
 0x11e   : > { %1297 = vmatprep.mubr.msk.bf16.mxu1 %vm1483_vm1, %v1482_v2  ;;  %v895_v49 = vsel %vm893_vm4, %v889_v48, 0  ;;  %1296 = vmatpush3.bf16.msra.mxu1 %v944_v51 }
 0x11f   : > { %1290 = vmatpush3.bf16.msra.mxu0 %v895_v49 }
 0x1f0   : > { %v871_v31 = vpop.f32.mrb[4].mxu1 }
 0x1f1   : > { %v872_v32 = vadd.f32 %v1231_v30, %v871_v31  ;;  %v1287_v33 = vpop.f32.mrb[5].mxu1 }
 0x1f2   : > { %v874_v34 = vpop.f32.mrb[6].mxu1 }
 0x1f3   : > { %v1288_v35 = vpop.f32.mrb[7].mxu1  ;;  %v877_v36 = vsel %vm830_vm3, %v872_v32, -inf }
 0x1f4   : > { %878 = vmax.xlane.f32.xlu0 %v877_v36 }
 0x281   : > { %v879_v37 = vpop.xlane.xlu0 %878 }
 0x282   : > { %v880_v38 = vsub.f32 %v872_v32, %v879_v37 }
 0x284   : > { %v881_v39 = vmul.f32 1.442695, %v880_v38 }
 0x286   : > { %1381 = vpow2.f32 %v881_v39 }
 0x290   : > { %v1382_v40 = vpop.eup %1381 }
 0x291   : > { %v883_v41 = vsel %vm830_vm3, %v1382_v40, 0.0 }
 0x292   : > { %884 = vadd.xlane.f32.xlu0 %v883_v41 }
 0x31f   : > { %v885_v52 = vpop.xlane.xlu0 %884 }
 0x320   : > { %1383 = vrcp.f32 %v885_v52 }
 0x32a   : > { %v1384_v53 = vpop.eup %1383 }
 0x32b   : > { %v887_v54 = vmul.f32 %v1384_v53, %v1382_v40 }
 0x32d   : > { %v888_v55 = vpack.c.bf16 %v887_v54, %v887_v54 }
 0x32f   : > { %1292 = vmatmul.mubr.msk.bf16.vlgmr.msra.gmra.mrb[8].mxu0 %vm830_vm3, %v888_v55 }
 0x402   : > { %v931_v56 = vpop.f32.mrb[8].mxu0 }
 0x403   : > { %v938_v57 = vpack.c.bf16 %v931_v56, %v931_v56  ;;  %v1293_v58 = vpop.f32.mrb[9].mxu0 }
 0x404   : > { %v934_v59 = vpop.f32.mrb[10].mxu0 }
 0x405   : > { %v1294_v60 = vpop.f32.mrb[11].mxu0  ;;  %1298 = vmatmul.mubr.msk.bf16.vlgmr.msra.gmra.mrb[8].mxu1 %vm830_vm3, %v938_v57 }
 0x4d5   : > { %991 = sbr.rel (%p1235_p1) target bundleno = 1254 (0x4e6), region = 76 }
 0x4d8   : > { %v980_v62 = vpop.f32.mrb[8].mxu1 }
 0x4d9   : > { %v986_v63 = vadd.f32 %v980_v62, %v937_v61  ;;  %v1299_v0 = vpop.f32.mrb[9].mxu1 }
 0x4da   : > { %v983_v1 = vpop.f32.mrb[10].mxu1 }
 0x4db   : > { %987 = vst.msk [vmem:[#allocation2] sm:$0xff] %vm645_vm2, %v986_v63  ;;  %v1300_v2 = vpop.f32.mrb[11].mxu1 }
 0x4e2   : > { %v992_v3 = vld [vmem:[#allocation2] sm:$0xff] }
 0x4e3   : > { %v1000_v5 = vadd.f32 %v1236_v4, %v992_v3 }
 0x4e5   : > { %1001 = vst.msk [vmem:[%s561_s3] sm:$0xff] %vm645_vm2, %v1000_v5 }
 0x4e6 PF: > { %s1853_s1 = sld [smem:[#allocation10_spill]]  ;;  %s1854_s4 = sld [smem:[#allocation7_spill]] }
 0x4e7   : > { %s1856_s13 = sld [smem:[#allocation23_spill]]  ;;  %s1017_s23 = sshll.u32 %s561_s3, 4  ;;  %s1018_s23 = int_to_ptr.vmem [resolvable:$true] %s1017_s23 }
 0x4e8   : > { %s1385_s11 = scalar_lea.vmem %s1018_s23, 128  ;;  %s1484_s24 = smov [#allocation3]  }
 0x4e9   : > { %p1386_p2 = scmp.ne.s32.totalorder %s1018_s23, %s1385_s11  ;;  %s1389_s14 = sshll.u32 %s1484_s24, 4  ;;  %s1390_s14 = int_to_ptr.vmem [resolvable:$false] %s1389_s14 }
 0x4ea   : > { %s1391_s26 = scalar_lea.vmem %s1390_s14, 256  ;;  %p1392_p6 = scmp.lt.s32.totalorder %s1018_s23, %s1390_s14 }
 0x4eb   : > { %p1387_p4 = pnand %p1386_p2, %p1599_p3  ;;  %p1393_p7 = scmp.lt.s32.totalorder %s1391_s26, %s1385_s11 }
 0x4ec   : > { %s1238_s21 = sshll.u32 %s1853_s1, 7  ;;  %s1857_s16 = sand.u32 1, %s1854_s4  }
 0x4ed   : > { %s1743_s27 = scalar_lea.hbm %s1856_s13, %s1238_s21  ;;  %s1003_s12 = scalar_lea.sflag [#allocation4], %s1857_s16 }
 0x4ee   : > { %p1388_p5 = pneg %p1387_p4  ;;  %p1394_p8 = por %p1393_p7, %p1392_p6 }
 0x4f0   : > { %p1395_p10 = pnand %p1394_p8, %p1388_p5 }
 0x4f2   : > { %1398 = shalt.err (!%p1395_p10)
}
 0x4f3   : > { %s1399_s29 = scalar_lea.hbm %s1743_s27, 128  ;;  %s1403_s18 = scalar_lea.hbm %s1856_s13, 256 }
 0x4f4   : > { %p1400_p11 = scmp.ne.s32.totalorder %s1743_s27, %s1399_s29  ;;  %p1404_p0 = scmp.lt.u32.totalorder %s1743_s27, %s1856_s13 }
 0x4f5   : > { %p1405_p1 = scmp.lt.u32.totalorder %s1403_s18, %s1399_s29  ;;  %p1407_p4 = scmp.lt.u32.totalorder %s1399_s29, %s1743_s27 }
 0x4f6   : > { %p1401_p12 = pnand %p1400_p11, %p1599_p3 }
 0x4f7   : > { %p1406_p2 = por %p1405_p1, %p1404_p0 }
 0x4f8   : > { %p1402_p13 = pneg %p1401_p12 }
 0x4f9   : > { %p1408_p5 = por %p1407_p4, %p1406_p2 }
 0x4fb   : > { %p1409_p6 = pnand %p1408_p5, %p1402_p13 }
 0x4fd   : > { %1412 = shalt.err (!%p1409_p6)
}
 0x4fe   : > { %1301 = dma.vmem_to_hbm [thread:$0]  (%p1599_p3), %s1018_s23, 128, %s1743_s27, %s1003_s12  }
 0x4ff PF: > { %s1858_s28 = sld [smem:[#allocation13_spill]]  ;;  %s1859_s25 = sld [smem:[#allocation6_spill]] }
 0x505   : > { %p1307_p7 = scmp.ge.s32.totalorder %s1858_s28, 2  ;;  %s1029_s4 = sand.u32 1, %s1859_s25  }
 0x506   : > { %s1030_s21 = scalar_lea.sflag [#allocation4], %s1029_s4 }
 0x507   : > { %p1304_p8 = pnand %p1307_p7, %p1609_p9 }
 0x509   : > { %1446 = dma.done.wait (!%p1304_p8), %s1030_s21, 128  }
 0x50a   : > { %1448 = vsyncadd (!%p1304_p8), %s1030_s21, 4294967168  ;;  %s25_s28 = sadd.s32 1, %s1858_s28   ;;  %s1861_s21 = sld [smem:[#allocation7_spill]] }
 0x50b   : > { %p22_p10 = scmp.ge.s32.totalorder %s25_s28, 10   ;;  %s1862_s22 = sld [smem:[#allocation8_spill]] }
 0x50c   : > { %s1863_s23 = sld [smem:[#allocation18_spill]]  ;;  %s1864_s24 = sld [smem:[#allocation11_spill]] }
 0x50d   : > { %s1865_s25 = sld [smem:[#allocation12_spill]]  ;;  %s1866_s26 = sld [smem:[#allocation14_spill]] }
 0x50e   : > { %s1867_s27 = sld [smem:[#allocation16_spill]]  ;;  %24 = sbr.rel (!%p22_p10) target bundleno = 11 (0xb), region = 141 }
 0x515   :  { %1035 = vsyncpa [#allocation4], 1 }
 0x516   :  { %1037 = vsyncpa [#allocation4 + $0x1], 1 }

</bundles_post_ra>
